<compile_context>
chip_gen: v5e
topology: v5e:2x2
jax: 0.10.0
libtpu: 0.0.40
codegen_flags: <defaults>
</compile_context>

<pallas_src>
import jax
import jax.numpy as jnp
from jax.experimental import pallas as pl
from jax.experimental.pallas import tpu as pltpu


def _conv1x1_kernel(w_ref, x_ref, o_ref):
    # w_ref: (C_out, C_in)  VMEM-resident weight tile
    # x_ref: (C_in, H*W)    one image, channels x pixels (native NCHW slice)
    # o_ref: (C_out, H*W)
    o_ref[...] = jnp.dot(
        w_ref[...], x_ref[...], preferred_element_type=jnp.float32
    ).astype(o_ref.dtype)


def conv1x1(x_nchw: jax.Array, weight_oi: jax.Array) -> jax.Array:
    """1x1 conv, stride 1, no bias, computed in native NCHW layout.

    x_nchw:    (N, C_in, H, W)
    weight_oi: (C_out, C_in)   (PyTorch Conv2d weight with 1x1 spatial squeezed)
    returns:   (N, C_out, H, W)
    """
    N, C_in, H, W = x_nchw.shape
    C_out = weight_oi.shape[0]
    HW = H * W

    # Free reshape (no data movement): (N, C_in, H, W) -> (N, C_in, H*W).
    x_rows = x_nchw.reshape(N, C_in, HW)

    itemsize = jnp.dtype(x_nchw.dtype).itemsize
    cost = pl.CostEstimate(
        flops=2 * N * C_out * C_in * HW,
        transcendentals=0,
        bytes_accessed=(N * C_in * HW + C_out * C_in + N * C_out * HW) * itemsize,
    )

    out_rows = pl.pallas_call(
        _conv1x1_kernel,
        out_shape=jax.ShapeDtypeStruct((N, C_out, HW), x_nchw.dtype),
        grid_spec=pltpu.PrefetchScalarGridSpec(
            num_scalar_prefetch=0,
            grid=(N,),
            in_specs=[
                # Weight: same block every step -> stays resident in VMEM.
                pl.BlockSpec((C_out, C_in), lambda n: (0, 0)),
                # One image per grid step; leading batch dim squeezed out.
                pl.BlockSpec((None, C_in, HW), lambda n: (n, 0, 0)),
            ],
            out_specs=pl.BlockSpec((None, C_out, HW), lambda n: (n, 0, 0)),
        ),
        compiler_params=pltpu.CompilerParams(
            dimension_semantics=("parallel",),
        ),
        cost_estimate=cost,
    )(weight_oi, x_rows)

    # Free reshape back: (N, C_out, H*W) -> (N, C_out, H, W).  No transpose.
    return out_rows.reshape(N, C_out, H, W)


if __name__ == "__main__":
    key = jax.random.PRNGKey(0)
    kx, kw = jax.random.split(key)

    # Shapes implied by the module: x348 = randn([1, 96, 7, 7]),
    # Conv2d(96, 96, kernel_size=1, bias=False).
    N, C_in, H, W = 1, 96, 7, 7
    C_out = 96

    x = jax.random.normal(kx, (N, C_in, H, W), dtype=jnp.float32)
    # Conv2d weight is (C_out, C_in, 1, 1); keep it squeezed to (C_out, C_in).
    weight = jax.random.normal(kw, (C_out, C_in), dtype=jnp.float32) * 0.05

    y = conv1x1(x, weight)
    jax.block_until_ready(y)

    # Reference check against plain-JAX einsum (same semantics as the conv).
    y_ref = jnp.einsum("oi,nihw->nohw", weight, x)
    assert y.shape == (N, C_out, H, W)
    assert jnp.allclose(y, y_ref, atol=1e-4, rtol=1e-4)

    print("KERNEL_OK")
</pallas_src>

<mosaic_0001>
module attributes {stable_mosaic.version = 11 : i64} {
  func.func @_conv1x1_kernel(%arg0: i32, %arg1: memref<96x96xf32, #tpu.memory_space<vmem>>, %arg2: memref<1x96x49xf32, #tpu.memory_space<vmem>>, %arg3: memref<1x96x49xf32, #tpu.memory_space<vmem>>) attributes {dimension_semantics = [#tpu.dimension_semantics<parallel>], iteration_bounds = array<i64: 1>, scalar_prefetch = 0 : i64, scratch_operands = 0 : i64, tpu.core_type = #tpu.core_type<tc>, window_params = [{pipeline_mode = #tpu.pipeline_mode<synchronous>, transform_indices = @transform_0, window_bounds = array<i64: 96, 96>}, {transform_indices = @transform_1, window_bounds = array<i64: 1, 96, 49>}, {transform_indices = @transform_2, window_bounds = array<i64: 1, 96, 49>}]} {
    %c0 = arith.constant 0 : index
    %c0_0 = arith.constant 0 : index
    %0 = vector.load %arg1[%c0, %c0_0] : memref<96x96xf32, #tpu.memory_space<vmem>>, vector<96x96xf32>
    %c0_1 = arith.constant 0 : index
    %c0_2 = arith.constant 0 : index
    %c0_3 = arith.constant 0 : index
    %1 = vector.load %arg2[%c0_1, %c0_2, %c0_3] : memref<1x96x49xf32, #tpu.memory_space<vmem>>, vector<1x96x49xf32>
    %2 = vector.shape_cast %1 : vector<1x96x49xf32> to vector<96x49xf32>
    %cst = arith.constant dense<0.000000e+00> : vector<96x49xf32>
    %3 = tpu.matmul %0, %2, %cst {dimension_numbers = #tpu.dot_dimension_numbers<[1], [0], [0], [1], [0, 0, 1, 1], [], []>} : vector<96x96xf32>, vector<96x49xf32>, vector<96x49xf32> -> vector<96x49xf32>
    %c0_4 = arith.constant 0 : index
    %c0_5 = arith.constant 0 : index
    %c0_6 = arith.constant 0 : index
    %4 = vector.load %arg3[%c0_4, %c0_5, %c0_6] : memref<1x96x49xf32, #tpu.memory_space<vmem>>, vector<1x96x49xf32>
    %5 = vector.shape_cast %4 : vector<1x96x49xf32> to vector<96x49xf32>
    %6 = vector.shape_cast %3 : vector<96x49xf32> to vector<1x96x49xf32>
    tpu.vector_store %arg3[%c0_4, %c0_5, %c0_6], %6 {strides = array<i32>} : memref<1x96x49xf32, #tpu.memory_space<vmem>>, vector<1x96x49xf32>,
    return
  }
  func.func @transform_0(%arg0: i32) -> (i32, i32) {
    %c0_i32 = arith.constant 0 : i32
    %c0_i32_0 = arith.constant 0 : i32
    %c0_i32_1 = arith.constant 0 : i32
    return %c0_i32, %c0_i32_0 : i32, i32
  }
  func.func @transform_1(%arg0: i32) -> (i32, i32, i32) {
    %c0_i32 = arith.constant 0 : i32
    %c0_i32_0 = arith.constant 0 : i32
    %c0_i32_1 = arith.constant 0 : i32
    return %arg0, %c0_i32, %c0_i32_0 : i32, i32, i32
  }
  func.func @transform_2(%arg0: i32) -> (i32, i32, i32) {
    %c0_i32 = arith.constant 0 : i32
    %c0_i32_0 = arith.constant 0 : i32
    %c0_i32_1 = arith.constant 0 : i32
    return %arg0, %c0_i32, %c0_i32_0 : i32, i32, i32
  }
}

</mosaic_0001>

<bundles_post_ra>
// kernel: tpu_custom_call.1
= control target key start
LH: loop header
LB: loop body
LE: loop exit
PB: predicated region body
PF: predicated region fallthrough
CT: control target
= control target key end

     0   :  { %vm35_vm0 = vcmask 785408   ;;  %vm125_vm1 = vcmask 400384   ;;  %s337_s1 = inlined_call_operand.vmem [shape: f32[1,96,49], index: 1, kind: input, shape index: {}]   ;;  %s338_s0 = inlined_call_operand.vmem [shape: f32[96,96], index: 0, kind: input, shape index: {}]   ;;  %s339_s2 = inlined_call_operand.vmem [shape: f32[1,96,49], index: 2, kind: output, shape index: {}]  }
   0x1   :  { %v34_v0 = vld [vmem:[%s337_s1 + $0x58] sm:$0xff]  ;;  %v33_v1 = vld [vmem:[%s337_s1 + $0x50] sm:$0xff]  ;;  %v32_v2 = vld [vmem:[%s337_s1 + $0x48] sm:$0xff] }
   0x2   :  { %155 = vmatpush.msra.mxu2 %v34_v0  ;;  %156 = vmatpush.msra.mxu3 %v34_v0  ;;  %v31_v3 = vld [vmem:[%s337_s1 + $0x40] sm:$0xff]  ;;  %v30_v4 = vld [vmem:[%s337_s1 + $0x38] sm:$0xff]  ;;  %v29_v5 = vld [vmem:[%s337_s1 + $0x30] sm:$0xff] }
   0x3   :  { %76 = vmatpush.msra.mxu0 %v34_v0  ;;  %154 = vmatpush.msra.mxu1 %v34_v0  ;;  %v28_v6 = vld [vmem:[%s337_s1 + $0x28] sm:$0xff]  ;;  %v27_v7 = vld [vmem:[%s337_s1 + $0x20] sm:$0xff]  ;;  %v26_v8 = vld [vmem:[%s337_s1 + $0x18] sm:$0xff] }
   0x4   :  { %158 = vmatpush.msra.mxu2 %v33_v1  ;;  %159 = vmatpush.msra.mxu3 %v33_v1  ;;  %v25_v9 = vld [vmem:[%s337_s1 + $0x10] sm:$0xff]  ;;  %v24_v10 = vld [vmem:[%s337_s1 + $0x8] sm:$0xff]  ;;  %v23_v11 = vld [vmem:[%s337_s1] sm:$0xff] }
   0x5   :  { %77 = vmatpush.msra.mxu0 %v33_v1  ;;  %157 = vmatpush.msra.mxu1 %v33_v1  ;;  %v17_v12 = vld [vmem:[%s338_s0 + $0x30] sm:$0xff]  ;;  %v20_v13 = vld [vmem:[%s338_s0 + $0x48] sm:$0xff]  ;;  %v11_v14 = vld [vmem:[%s338_s0] sm:$0xff] }
   0x6   :  { %161 = vmatpush.msra.mxu2 %v32_v2  ;;  %162 = vmatpush.msra.mxu3 %v32_v2  ;;  %v14_v15 = vld [vmem:[%s338_s0 + $0x18] sm:$0xff]  ;;  %v21_v17 = vld [vmem:[%s338_s0 + $0x50] sm:$0xff]  ;;  %v12_v18 = vld [vmem:[%s338_s0 + $0x8] sm:$0xff] }
   0x7   :  { %78 = vmatpush.msra.mxu0 %v32_v2  ;;  %160 = vmatpush.msra.mxu1 %v32_v2  ;;  %v18_v16 = vld [vmem:[%s338_s0 + $0x38] sm:$0xff]  ;;  %v15_v19 = vld [vmem:[%s338_s0 + $0x20] sm:$0xff]  ;;  %v13_v22 = vld [vmem:[%s338_s0 + $0x10] sm:$0xff] }
   0x8   :  { %164 = vmatpush.msra.mxu2 %v31_v3  ;;  %165 = vmatpush.msra.mxu3 %v31_v3  ;;  %v19_v20 = vld [vmem:[%s338_s0 + $0x40] sm:$0xff]  ;;  %v22_v21 = vld [vmem:[%s338_s0 + $0x58] sm:$0xff]  ;;  %v16_v23 = vld [vmem:[%s338_s0 + $0x28] sm:$0xff] }
   0x9   :  { %79 = vmatpush.msra.mxu0 %v31_v3  ;;  %163 = vmatpush.msra.mxu1 %v31_v3 }
   0xa   :  { %167 = vmatpush.msra.mxu2 %v30_v4  ;;  %168 = vmatpush.msra.mxu3 %v30_v4 }
   0xb   :  { %80 = vmatpush.msra.mxu0 %v30_v4  ;;  %166 = vmatpush.msra.mxu1 %v30_v4 }
   0xc   :  { %170 = vmatpush.msra.mxu2 %v29_v5  ;;  %171 = vmatpush.msra.mxu3 %v29_v5 }
   0xd   :  { %81 = vmatpush.msra.mxu0 %v29_v5  ;;  %169 = vmatpush.msra.mxu1 %v29_v5 }
   0xe   :  { %173 = vmatpush.msra.mxu2 %v28_v6  ;;  %174 = vmatpush.msra.mxu3 %v28_v6 }
   0xf   :  { %82 = vmatpush.msra.mxu0 %v28_v6  ;;  %172 = vmatpush.msra.mxu1 %v28_v6 }
  0x10   :  { %176 = vmatpush.msra.mxu2 %v27_v7  ;;  %177 = vmatpush.msra.mxu3 %v27_v7 }
  0x11   :  { %83 = vmatpush.msra.mxu0 %v27_v7  ;;  %175 = vmatpush.msra.mxu1 %v27_v7 }
  0x12   :  { %179 = vmatpush.msra.mxu2 %v26_v8  ;;  %180 = vmatpush.msra.mxu3 %v26_v8 }
  0x13   :  { %84 = vmatpush.msra.mxu0 %v26_v8  ;;  %178 = vmatpush.msra.mxu1 %v26_v8 }
  0x14   :  { %182 = vmatpush.msra.mxu2 %v25_v9  ;;  %183 = vmatpush.msra.mxu3 %v25_v9 }
  0x15   :  { %85 = vmatpush.msra.mxu0 %v25_v9  ;;  %181 = vmatpush.msra.mxu1 %v25_v9 }
  0x16   :  { %185 = vmatpush.msra.mxu2 %v24_v10  ;;  %186 = vmatpush.msra.mxu3 %v24_v10 }
  0x17   :  { %86 = vmatpush.msra.mxu0 %v24_v10  ;;  %184 = vmatpush.msra.mxu1 %v24_v10 }
  0x18   :  { %188 = vmatpush.msra.mxu2 %v23_v11  ;;  %189 = vmatpush.msra.mxu3 %v23_v11 }
  0x19   :  { %148 = vmatmul.msk.f32.vlgmr.msra.gmra.mxu2 %vm35_vm0, %v17_v12  ;;  %151 = vmatmul.msk.f32.vlgmr.msra.gmra.mxu3 %vm35_vm0, %v20_v13 }
  0x1a   :  { %87 = vmatpush.msra.mxu0 %v23_v11  ;;  %187 = vmatpush.msra.mxu1 %v23_v11 }
  0x1b   :  { %142 = vmatmul.msk.f32.vlgmr.msra.gmra.mxu0 %vm35_vm0, %v11_v14  ;;  %145 = vmatmul.msk.f32.vlgmr.msra.gmra.mxu1 %vm35_vm0, %v14_v15 }
  0x21   :  { %149 = vmatmul.msk.f32.gmra.mxu2 %vm35_vm0, %v18_v16  ;;  %152 = vmatmul.msk.f32.gmra.mxu3 %vm35_vm0, %v21_v17 }
  0x23   :  { %143 = vmatmul.msk.f32.gmra.mxu0 %vm35_vm0, %v12_v18  ;;  %146 = vmatmul.msk.f32.gmra.mxu1 %vm35_vm0, %v15_v19 }
  0x29   :  { %150 = vmatmul.msk.f32.gmra.mxu2 %vm35_vm0, %v19_v20  ;;  %153 = vmatmul.msk.f32.gmra.mxu3 %vm35_vm0, %v22_v21 }
  0x2b   :  { %144 = vmatmul.msk.f32.gmra.mxu0 %vm35_vm0, %v13_v22  ;;  %147 = vmatmul.msk.f32.gmra.mxu1 %vm35_vm0, %v16_v23 }
  0x98   :  { %v89_v24 = vpop.f32.mrf.mxu0  ;;  %v98_v25 = vpop.f32.mrf.mxu1 }
  0x99   :  { %126 = vst.msk [vmem:[%s339_s2] sm:$0xff] %vm125_vm1, %v89_v24 }
  0x9a   :  { %129 = vst.msk [vmem:[%s339_s2 + $0x18] sm:$0xff] %vm125_vm1, %v98_v25 }
  0x9c   :  { %v107_v26 = vpop.f32.mrf.mxu2  ;;  %v116_v27 = vpop.f32.mrf.mxu3 }
  0x9d   :  { %132 = vst.msk [vmem:[%s339_s2 + $0x30] sm:$0xff] %vm125_vm1, %v107_v26 }
  0x9e   :  { %135 = vst.msk [vmem:[%s339_s2 + $0x48] sm:$0xff] %vm125_vm1, %v116_v27 }
  0xa0   :  { %v92_v28 = vpop.f32.mrf.mxu0  ;;  %v101_v29 = vpop.f32.mrf.mxu1 }
  0xa1   :  { %127 = vst.msk [vmem:[%s339_s2 + $0x8] sm:$0xff] %vm125_vm1, %v92_v28 }
  0xa2   :  { %130 = vst.msk [vmem:[%s339_s2 + $0x20] sm:$0xff] %vm125_vm1, %v101_v29 }
  0xa4   :  { %v110_v30 = vpop.f32.mrf.mxu2  ;;  %v119_v31 = vpop.f32.mrf.mxu3 }
  0xa5   :  { %133 = vst.msk [vmem:[%s339_s2 + $0x38] sm:$0xff] %vm125_vm1, %v110_v30 }
  0xa6   :  { %136 = vst.msk [vmem:[%s339_s2 + $0x50] sm:$0xff] %vm125_vm1, %v119_v31 }
  0xa8   :  { %v95_v32 = vpop.f32.mrf.mxu0  ;;  %v104_v33 = vpop.f32.mrf.mxu1 }
  0xa9   :  { %128 = vst.msk [vmem:[%s339_s2 + $0x10] sm:$0xff] %vm125_vm1, %v95_v32 }
  0xaa   :  { %131 = vst.msk [vmem:[%s339_s2 + $0x28] sm:$0xff] %vm125_vm1, %v104_v33 }
  0xac   :  { %v113_v34 = vpop.f32.mrf.mxu2  ;;  %v122_v35 = vpop.f32.mrf.mxu3 }
  0xad   :  { %134 = vst.msk [vmem:[%s339_s2 + $0x40] sm:$0xff] %vm125_vm1, %v113_v34 }
  0xae   :  { %137 = vst.msk [vmem:[%s339_s2 + $0x58] sm:$0xff] %vm125_vm1, %v122_v35 }

</bundles_post_ra>
